<compile_context>
chip_gen: v6e
topology: v6e:2x2x1
jax: 0.10.0
libtpu: 0.0.40
codegen_flags: <defaults>
</compile_context>

<pallas_src>
import jax
import jax.numpy as jnp
from jax import lax
from jax.experimental import pallas as pl
from jax.experimental.pallas import tpu as pltpu

HIDDEN_DIM = 256
DEFAULT_MAX_TILE_B = 2048            # batch rows per grid step (see header)
VMEM_LIMIT_BYTES = 48 * 1024 * 1024  # > 32 MiB scoped default, < v7x physical


def critic_kernel(x_ref, w1_ref, b1_ref, w2_ref, b2_ref, w3_ref, b3_ref, o_ref):
    """fc1 -> relu -> fc2 -> relu -> value head, one batch tile per grid step.

    x_ref:  (TILE_B, F)   bf16
    w1_ref: (F, 256)      bf16     b1_ref: (1, 256) f32
    w2_ref: (256, 256)    bf16     b2_ref: (1, 256) f32
    w3_ref: (1, 256)      f32      b3_ref: (1, 1)   f32
    o_ref:  (1, TILE_B)   f32   (lane-dense value row)
    """
    x = x_ref[...]
    h1 = jnp.dot(x, w1_ref[...], preferred_element_type=jnp.float32) + b1_ref[...]
    h1 = jnp.maximum(h1, 0.0)                                  # ReLU (VPU)
    h2 = jnp.dot(h1.astype(jnp.bfloat16), w2_ref[...],
                 preferred_element_type=jnp.float32) + b2_ref[...]
    h2 = jnp.maximum(h2, 0.0)                                  # ReLU (VPU)
    # Value head: (1, 256) . (TILE_B, 256)^T -> (1, TILE_B).  Contracting the
    # hidden dim of both operands gives the lane-dense row directly (no
    # (TILE_B, 1) sliver store, no explicit transpose); cost is negligible next
    # to fc1/fc2.
    v = lax.dot_general(
        w3_ref[...], h2,
        dimension_numbers=(((1,), (1,)), ((), ())),
        preferred_element_type=jnp.float32,
    ) + b3_ref[...]
    o_ref[...] = v


def _round_up(n, m):
    return ((n + m - 1) // m) * m


def _choose_tiling(B, max_tile_b):
    """Pick (num_tiles, tile_b): few, large tiles; >=2 tiles when B > 8 so both
    TensorCores are used on v7x; tile_b a multiple of 8 sublanes."""
    num_tiles = max(1, -(-B // max_tile_b))
    if num_tiles == 1 and B > 8:
        num_tiles = 2
    tile_b = _round_up(max(1, -(-B // num_tiles)), 8)
    return num_tiles, tile_b


def critic_forward(features, params, max_tile_b=DEFAULT_MAX_TILE_B):
    """features: (B, features_dim) f32 -> (B,) f32."""
    B, F = features.shape
    w1, b1, w2, b2, w3_row, b3 = params

    num_tiles, tile_b = _choose_tiling(B, max_tile_b)
    B_pad = num_tiles * tile_b

    # bf16 MXU operands (f32 accumulation stays inside the kernel).
    x = features.astype(jnp.bfloat16)
    if B_pad != B:
        x = jnp.pad(x, ((0, B_pad - B), (0, 0)))
    w1b = w1.astype(jnp.bfloat16)
    w2b = w2.astype(jnp.bfloat16)

    def const_spec(shape):
        # Same block every grid step -> DMA'd once, stays resident in VMEM.
        return pl.BlockSpec(shape, lambda i: (0, 0))

    flops = 2 * B_pad * (F * HIDDEN_DIM + HIDDEN_DIM * HIDDEN_DIM + HIDDEN_DIM)
    bytes_accessed = (
        B_pad * (F * 2 + 4)                                   # x bf16 in, f32 out
        + (F * HIDDEN_DIM + HIDDEN_DIM * HIDDEN_DIM) * 2      # bf16 weights
        + (3 * HIDDEN_DIM + 1) * 4                            # biases + value row
    )

    out = pl.pallas_call(
        critic_kernel,
        out_shape=jax.ShapeDtypeStruct((num_tiles, tile_b), jnp.float32),
        grid=(num_tiles,),
        in_specs=[
            pl.BlockSpec((tile_b, F), lambda i: (i, 0)),   # x tile (pipelined)
            const_spec((F, HIDDEN_DIM)),                   # w1 (bf16)
            const_spec((1, HIDDEN_DIM)),                   # b1
            const_spec((HIDDEN_DIM, HIDDEN_DIM)),          # w2 (bf16)
            const_spec((1, HIDDEN_DIM)),                   # b2
            const_spec((1, HIDDEN_DIM)),                   # w3 row
            const_spec((1, 1)),                            # b3
        ],
        out_specs=pl.BlockSpec((1, tile_b), lambda i: (i, 0)),  # lane-dense row
        compiler_params=pltpu.CompilerParams(
            dimension_semantics=("parallel",),             # megacore on v7x
            vmem_limit_bytes=VMEM_LIMIT_BYTES,
        ),
        cost_estimate=pl.CostEstimate(
            flops=flops, transcendentals=0, bytes_accessed=bytes_accessed),
    )(x, w1b, b1, w2b, b2, w3_row, b3)

    return out.reshape(-1)[:B]   # drop batch padding, squeeze(-1)


def init_params(key, features_dim):
    """Deterministic init mimicking nn.Linear defaults + uniform(-3e-3, 3e-3)
    on the value head. fc1/fc2 weights stored (in_dim, out_dim); the value head
    weight is a (1, HIDDEN_DIM) row.  Stored in f32 (cast to bf16 at call)."""
    k1, k2, k3, k4, k5, k6 = jax.random.split(key, 6)

    def linear_init(kw, kb, fan_in, fan_out):
        bound = 1.0 / jnp.sqrt(fan_in)
        w = jax.random.uniform(kw, (fan_in, fan_out), jnp.float32, -bound, bound)
        b = jax.random.uniform(kb, (1, fan_out), jnp.float32, -bound, bound)
        return w, b

    w1, b1 = linear_init(k1, k2, features_dim, HIDDEN_DIM)
    w2, b2 = linear_init(k3, k4, HIDDEN_DIM, HIDDEN_DIM)
    w3_row = jax.random.uniform(k5, (1, HIDDEN_DIM), jnp.float32, -0.003, 0.003)
    b3 = jax.random.uniform(k6, (1, 1), jnp.float32, -0.003, 0.003)
    return (w1, b1, w2, b2, w3_row, b3)


def critic_ref(features, params):
    """Pure-JAX f32 reference of the PyTorch forward."""
    w1, b1, w2, b2, w3_row, b3 = params
    x = jnp.maximum(features @ w1 + b1, 0.0)
    x = jnp.maximum(x @ w2 + b2, 0.0)
    v = x @ w3_row.T + b3
    return v[:, 0]


if __name__ == "__main__":
    key = jax.random.PRNGKey(0)
    k_feat, k_params, k_big = jax.random.split(key, 3)

    features_dim = 32
    params = init_params(k_params, features_dim)
    fwd = jax.jit(critic_forward)

    # bf16 MXU operands -> compare against the f32 reference with a relaxed
    # tolerance (per perf review).
    ATOL = RTOL = 1e-2

    # Small case (single grid step, latency-bound path).
    batch = 8
    features = jax.random.normal(k_feat, (batch, features_dim), jnp.float32)
    value = jax.block_until_ready(fwd(features, params))
    ref = critic_ref(features, params)
    assert value.shape == (batch,)
    assert jnp.allclose(value, ref, atol=ATOL, rtol=RTOL), (value, ref)

    # Larger, non-multiple-of-tile case (exercises >=2 tiles + padding path).
    batch_big = 300
    features_big = jax.random.normal(k_big, (batch_big, features_dim), jnp.float32)
    value_big = jax.block_until_ready(fwd(features_big, params))
    ref_big = critic_ref(features_big, params)
    assert value_big.shape == (batch_big,)
    assert jnp.allclose(value_big, ref_big, atol=ATOL, rtol=RTOL)

    print("KERNEL_OK")
</pallas_src>

<mosaic_0001>
module attributes {stable_mosaic.version = 11 : i64} {
  func.func @critic_kernel(%arg0: i32, %arg1: memref<8x32xbf16, #tpu.memory_space<vmem>>, %arg2: memref<32x256xbf16, #tpu.memory_space<vmem>>, %arg3: memref<1x256xf32, #tpu.memory_space<vmem>>, %arg4: memref<256x256xbf16, #tpu.memory_space<vmem>>, %arg5: memref<1x256xf32, #tpu.memory_space<vmem>>, %arg6: memref<1x256xf32, #tpu.memory_space<vmem>>, %arg7: memref<1x1xf32, #tpu.memory_space<vmem>>, %arg8: memref<1x8xf32, #tpu.memory_space<vmem>>) attributes {dimension_semantics = [#tpu.dimension_semantics<parallel>], iteration_bounds = array<i64: 1>, scalar_prefetch = 0 : i64, scratch_operands = 0 : i64, tpu.core_type = #tpu.core_type<tc>, window_params = [{transform_indices = @transform_0, window_bounds = array<i64: 8, 32>}, {pipeline_mode = #tpu.pipeline_mode<synchronous>, transform_indices = @transform_1, window_bounds = array<i64: 32, 256>}, {pipeline_mode = #tpu.pipeline_mode<synchronous>, transform_indices = @transform_2, window_bounds = array<i64: 1, 256>}, {pipeline_mode = #tpu.pipeline_mode<synchronous>, transform_indices = @transform_3, window_bounds = array<i64: 256, 256>}, {pipeline_mode = #tpu.pipeline_mode<synchronous>, transform_indices = @transform_4, window_bounds = array<i64: 1, 256>}, {pipeline_mode = #tpu.pipeline_mode<synchronous>, transform_indices = @transform_5, window_bounds = array<i64: 1, 256>}, {pipeline_mode = #tpu.pipeline_mode<synchronous>, transform_indices = @transform_6, window_bounds = array<i64: 1, 1>}, {transform_indices = @transform_7, window_bounds = array<i64: 1, 8>}]} {
    %c0 = arith.constant 0 : index
    %c0_0 = arith.constant 0 : index
    %0 = vector.load %arg1[%c0, %c0_0] : memref<8x32xbf16, #tpu.memory_space<vmem>>, vector<8x32xbf16>
    %c0_1 = arith.constant 0 : index
    %c0_2 = arith.constant 0 : index
    %1 = vector.load %arg2[%c0_1, %c0_2] : memref<32x256xbf16, #tpu.memory_space<vmem>>, vector<32x256xbf16>
    %cst = arith.constant dense<0.000000e+00> : vector<8x256xf32>
    %2 = tpu.matmul %0, %1, %cst {dimension_numbers = #tpu.dot_dimension_numbers<[1], [0], [0], [1], [0, 0, 1, 1], [], []>} : vector<8x32xbf16>, vector<32x256xbf16>, vector<8x256xf32> -> vector<8x256xf32>
    %c0_3 = arith.constant 0 : index
    %c0_4 = arith.constant 0 : index
    %3 = vector.load %arg3[%c0_3, %c0_4] : memref<1x256xf32, #tpu.memory_space<vmem>>, vector<1x256xf32>
    %4 = vector.broadcast %3 : vector<1x256xf32> to vector<8x256xf32>
    %5 = arith.addf %2, %4 : vector<8x256xf32>
    %cst_5 = arith.constant 0.000000e+00 : f32
    %6 = vector.broadcast %cst_5 : f32 to vector<8x256xf32>
    %7 = arith.maximumf %5, %6 : vector<8x256xf32>
    %8 = arith.truncf %7 : vector<8x256xf32> to vector<8x256xbf16>
    %c0_6 = arith.constant 0 : index
    %c0_7 = arith.constant 0 : index
    %9 = vector.load %arg4[%c0_6, %c0_7] : memref<256x256xbf16, #tpu.memory_space<vmem>>, vector<256x256xbf16>
    %cst_8 = arith.constant dense<0.000000e+00> : vector<8x256xf32>
    %10 = tpu.matmul %8, %9, %cst_8 {dimension_numbers = #tpu.dot_dimension_numbers<[1], [0], [0], [1], [0, 0, 1, 1], [], []>} : vector<8x256xbf16>, vector<256x256xbf16>, vector<8x256xf32> -> vector<8x256xf32>
    %c0_9 = arith.constant 0 : index
    %c0_10 = arith.constant 0 : index
    %11 = vector.load %arg5[%c0_9, %c0_10] : memref<1x256xf32, #tpu.memory_space<vmem>>, vector<1x256xf32>
    %12 = vector.broadcast %11 : vector<1x256xf32> to vector<8x256xf32>
    %13 = arith.addf %10, %12 : vector<8x256xf32>
    %cst_11 = arith.constant 0.000000e+00 : f32
    %14 = vector.broadcast %cst_11 : f32 to vector<8x256xf32>
    %15 = arith.maximumf %13, %14 : vector<8x256xf32>
    %c0_12 = arith.constant 0 : index
    %c0_13 = arith.constant 0 : index
    %16 = vector.load %arg6[%c0_12, %c0_13] : memref<1x256xf32, #tpu.memory_space<vmem>>, vector<1x256xf32>
    %cst_14 = arith.constant dense<0.000000e+00> : vector<1x8xf32>
    %17 = tpu.matmul %16, %15, %cst_14 {dimension_numbers = #tpu.dot_dimension_numbers<[1], [1], [0], [0], [0, 0, 1, 0], [], []>} : vector<1x256xf32>, vector<8x256xf32>, vector<1x8xf32> -> vector<1x8xf32>
    %c0_15 = arith.constant 0 : index
    %c0_16 = arith.constant 0 : index
    %18 = vector.load %arg7[%c0_15, %c0_16] : memref<1x1xf32, #tpu.memory_space<vmem>>, vector<1x1xf32>
    %19 = vector.broadcast %18 : vector<1x1xf32> to vector<1x8xf32>
    %20 = arith.addf %17, %19 : vector<1x8xf32>
    %c0_17 = arith.constant 0 : index
    %c0_18 = arith.constant 0 : index
    %21 = vector.load %arg8[%c0_17, %c0_18] : memref<1x8xf32, #tpu.memory_space<vmem>>, vector<1x8xf32>
    tpu.vector_store %arg8[%c0_17, %c0_18], %20 {strides = array<i32>} : memref<1x8xf32, #tpu.memory_space<vmem>>, vector<1x8xf32>,
    return
  }
  func.func @transform_0(%arg0: i32) -> (i32, i32) {
    %c0_i32 = arith.constant 0 : i32
    %c0_i32_0 = arith.constant 0 : i32
    return %arg0, %c0_i32 : i32, i32
  }
  func.func @transform_1(%arg0: i32) -> (i32, i32) {
    %c0_i32 = arith.constant 0 : i32
    %c0_i32_0 = arith.constant 0 : i32
    %c0_i32_1 = arith.constant 0 : i32
    return %c0_i32, %c0_i32_0 : i32, i32
  }
  func.func @transform_2(%arg0: i32) -> (i32, i32) {
    %c0_i32 = arith.constant 0 : i32
    %c0_i32_0 = arith.constant 0 : i32
    %c0_i32_1 = arith.constant 0 : i32
    return %c0_i32, %c0_i32_0 : i32, i32
  }
  func.func @transform_3(%arg0: i32) -> (i32, i32) {
    %c0_i32 = arith.constant 0 : i32
    %c0_i32_0 = arith.constant 0 : i32
    %c0_i32_1 = arith.constant 0 : i32
    return %c0_i32, %c0_i32_0 : i32, i32
  }
  func.func @transform_4(%arg0: i32) -> (i32, i32) {
    %c0_i32 = arith.constant 0 : i32
    %c0_i32_0 = arith.constant 0 : i32
    %c0_i32_1 = arith.constant 0 : i32
    return %c0_i32, %c0_i32_0 : i32, i32
  }
  func.func @transform_5(%arg0: i32) -> (i32, i32) {
    %c0_i32 = arith.constant 0 : i32
    %c0_i32_0 = arith.constant 0 : i32
    %c0_i32_1 = arith.constant 0 : i32
    return %c0_i32, %c0_i32_0 : i32, i32
  }
  func.func @transform_6(%arg0: i32) -> (i32, i32) {
    %c0_i32 = arith.constant 0 : i32
    %c0_i32_0 = arith.constant 0 : i32
    %c0_i32_1 = arith.constant 0 : i32
    return %c0_i32, %c0_i32_0 : i32, i32
  }
  func.func @transform_7(%arg0: i32) -> (i32, i32) {
    %c0_i32 = arith.constant 0 : i32
    %c0_i32_0 = arith.constant 0 : i32
    return %arg0, %c0_i32 : i32, i32
  }
}

</mosaic_0001>

<bundles_post_ra>
// kernel: critic_forward.1
= control target key start
LH: loop header
LB: loop body
LE: loop exit
PB: predicated region body
PF: predicated region fallthrough
CT: control target
= control target key end

     0   :  { %s755_s0 = inlined_call_operand.vmem [shape: bf16[8,32], index: 0, kind: input, shape index: {}]   ;;  %s756_s1 = inlined_call_operand.vmem [shape: bf16[32,256], index: 1, kind: input, shape index: {}]   ;;  %s757_s2 = inlined_call_operand.vmem [shape: f32[1,256], index: 2, kind: input, shape index: {}]   ;;  %s758_s3 = inlined_call_operand.vmem [shape: bf16[256,256], index: 3, kind: input, shape index: {}]   ;;  %s759_s4 = inlined_call_operand.vmem [shape: f32[1,256], index: 4, kind: input, shape index: {}]   ;;  %s760_s5 = inlined_call_operand.vmem [shape: f32[1,256], index: 5, kind: input, shape index: {}]   ;;  %s761_s6 = inlined_call_operand.<no memory space> [shape: f32[1,1], index: 6, kind: input, shape index: {}]   ;;  %s762_s7 = inlined_call_operand.hbm [shape: f32[1,8], index: 7, kind: output, shape index: {}]  }
   0x1   :  { %v12_v0 = vstv %s761_s6 }
   0x2   :  { %13 = vst [vmem:[#allocation2] sm:$0x1] %v12_v0 }
   0x3   :  { %v511_v1 = vld [vmem:[%s756_s1 + $0x14] ss:$8 sps:$4 sm:$0xff]   ;;  %v513_v2 = vld [vmem:[%s756_s1 + $0x10] ss:$8 sps:$4 sm:$0xff]   ;;  %v587_v3 = vmov 0   ;;  %vm67_vm0 = vcmask 261120  }
   0x4   :  { %103 = vmatprep.mubr.bf16.mxu0 %v587_v3  ;;  %510 = vset.pattern.permute.xlu0 %v587_v3  ;;  %v514_v4 = vld [vmem:[%s756_s1 + $0x4] ss:$8 sps:$4 sm:$0xff]   ;;  %v516_v5 = vld [vmem:[%s756_s1] ss:$8 sps:$4 sm:$0xff]   ;;  %v517_v6 = vld [vmem:[%s758_s3 + $0x74] ss:$8 sps:$4 sm:$0xff]  }
   0x5   :  { %83 = vmatprep.subr.bf16.mxu0 %v511_v1  ;;  %v519_v7 = vld [vmem:[%s758_s3 + $0x70] ss:$8 sps:$4 sm:$0xff]   ;;  %320 = vmatprep.subr.bf16.mxu1 %v517_v6  ;;  %v520_v8 = vld [vmem:[%s758_s3 + $0x64] ss:$8 sps:$4 sm:$0xff]   ;;  %v30_v9 = vld [vmem:[%s755_s0] sm:$0xf] }
   0x6   :  { %84 = vmatpush1.bf16.msra.mxu0 %v513_v2  ;;  %321 = vmatpush1.bf16.msra.mxu1 %v519_v7  ;;  %v522_v10 = vld [vmem:[%s758_s3 + $0x60] ss:$8 sps:$4 sm:$0xff]   ;;  %v523_v11 = vld [vmem:[%s758_s3 + $0x54] ss:$8 sps:$4 sm:$0xff]   ;;  %v525_v12 = vld [vmem:[%s758_s3 + $0x50] ss:$8 sps:$4 sm:$0xff]  }
   0x7   :  { %85 = vmatprep.subr.bf16.mxu0 %v514_v4  ;;  %322 = vmatprep.subr.bf16.mxu1 %v520_v8  ;;  %v526_v13 = vld [vmem:[%s758_s3 + $0x44] ss:$8 sps:$4 sm:$0xff]   ;;  %v528_v14 = vld [vmem:[%s758_s3 + $0x40] ss:$8 sps:$4 sm:$0xff]   ;;  %v529_v15 = vld [vmem:[%s758_s3 + $0x34] ss:$8 sps:$4 sm:$0xff]  }
   0x8   :  { %v531_v16 = vld [vmem:[%s758_s3 + $0x30] ss:$8 sps:$4 sm:$0xff]   ;;  %v532_v17 = vld [vmem:[%s758_s3 + $0x24] ss:$8 sps:$4 sm:$0xff]   ;;  %v534_v18 = vld [vmem:[%s758_s3 + $0x20] ss:$8 sps:$4 sm:$0xff]  }
   0x9   :  { %v535_v19 = vld [vmem:[%s758_s3 + $0x14] ss:$8 sps:$4 sm:$0xff]  }
   0xa   :  { %86 = vmatpush1.bf16.msra.mxu0 %v516_v5  ;;  %323 = vmatpush1.bf16.msra.mxu1 %v522_v10 }
   0xb   :  { %324 = vmatprep.subr.bf16.mxu1 %v523_v11 }
   0xd   :  { %475 = vmatmul.mubr.msk.bf16.vlgmr.msra.gmra.mxu0 %vm67_vm0, %v30_v9 }
   0xe   :  { %325 = vmatpush1.bf16.msra.mxu1 %v525_v12 }
   0xf   :  { %326 = vmatprep.subr.bf16.mxu1 %v526_v13 }
  0x12   :  { %327 = vmatpush1.bf16.msra.mxu1 %v528_v14 }
  0x13   :  { %328 = vmatprep.subr.bf16.mxu1 %v529_v15 }
  0x16   :  { %329 = vmatpush1.bf16.msra.mxu1 %v531_v16 }
  0x17   :  { %330 = vmatprep.subr.bf16.mxu1 %v532_v17 }
  0x18   :  { %14 = vsyncpa [#allocation4], 0  ;;  %v537_v20 = vld [vmem:[%s758_s3 + $0x10] ss:$8 sps:$4 sm:$0xff]   ;;  %v538_v21 = vld [vmem:[%s758_s3 + $0x4] ss:$8 sps:$4 sm:$0xff]   ;;  %v37_v39 = vlaneseq }
  0x19   :  { %v540_v22 = vld [vmem:[%s758_s3] ss:$8 sps:$4 sm:$0xff]   ;;  %v541_v23 = vld [vmem:[%s758_s3 + $0xf4] ss:$8 sps:$4 sm:$0xff]   ;;  %v543_v24 = vld [vmem:[%s758_s3 + $0xf0] ss:$8 sps:$4 sm:$0xff]  }
  0x1a   :  { %331 = vmatpush1.bf16.msra.mxu1 %v534_v18  ;;  %v544_v25 = vld [vmem:[%s758_s3 + $0xe4] ss:$8 sps:$4 sm:$0xff]   ;;  %v546_v26 = vld [vmem:[%s758_s3 + $0xe0] ss:$8 sps:$4 sm:$0xff]   ;;  %v547_v27 = vld [vmem:[%s758_s3 + $0xd4] ss:$8 sps:$4 sm:$0xff]  }
  0x1b   :  { %332 = vmatprep.subr.bf16.mxu1 %v535_v19  ;;  %v549_v28 = vld [vmem:[%s758_s3 + $0xd0] ss:$8 sps:$4 sm:$0xff]   ;;  %v550_v29 = vld [vmem:[%s758_s3 + $0xc4] ss:$8 sps:$4 sm:$0xff]   ;;  %v552_v30 = vld [vmem:[%s758_s3 + $0xc0] ss:$8 sps:$4 sm:$0xff]  }
  0x1c   :  { %v553_v31 = vld [vmem:[%s758_s3 + $0xb4] ss:$8 sps:$4 sm:$0xff]   ;;  %v555_v32 = vld [vmem:[%s758_s3 + $0xb0] ss:$8 sps:$4 sm:$0xff]   ;;  %v556_v33 = vld [vmem:[%s758_s3 + $0xa4] ss:$8 sps:$4 sm:$0xff]  }
  0x1d   :  { %v558_v34 = vld [vmem:[%s758_s3 + $0xa0] ss:$8 sps:$4 sm:$0xff]   ;;  %v559_v35 = vld [vmem:[%s758_s3 + $0x94] ss:$8 sps:$4 sm:$0xff]   ;;  %v561_v36 = vld [vmem:[%s758_s3 + $0x90] ss:$8 sps:$4 sm:$0xff]  }
  0x1e   :  { %333 = vmatpush1.bf16.msra.mxu1 %v537_v20  ;;  %v562_v37 = vld [vmem:[%s758_s3 + $0x84] ss:$8 sps:$4 sm:$0xff]   ;;  %v564_v38 = vld [vmem:[%s758_s3 + $0x80] ss:$8 sps:$4 sm:$0xff]   ;;  %v38_v40 = vshrl.u32 %v37_v39, 7  ;;  %vm455_vm1 = vcmask 57344  }
  0x1f   :  { %334 = vmatprep.subr.bf16.mxu1 %v538_v21  ;;  %v35_v42 = vld [vmem:[%s757_s2] sm:$0x3] }
  0x20   :  { %v39_v41 = vsub.s32 0, %v38_v40  ;;  %v43_v43 = vsub.s32 1, %v38_v40  ;;  %v363_v56 = vld [vmem:[%s760_s5] sm:$0x3]  ;;  %s588_s5 = smov [#allocation3]  }
  0x21   :  { %v364_v58 = vld [vmem:[#allocation2] sm:$0x1]  ;;  %s463_s26 = sshll.u32 %s588_s5, 4  ;;  %s464_s26 = int_to_ptr.vmem [resolvable:$true] %s463_s26 }
  0x22   :  { %335 = vmatpush1.bf16.msra.mxu1 %v540_v22  ;;  %v40_v44 = vrot.slane %v35_v42, %v39_v41  ;;  %v44_v45 = vrot.slane %v35_v42, %v43_v43  ;;  %v382_v57 = vrot.slane %v363_v56, %v43_v43  ;;  %367 = vperm.xlu0 %510, %v364_v58   ;;  %v148_v59 = vld [vmem:[%s759_s4] sm:$0x3]  ;;  %s565_s4 = scalar_lea.vmem %s464_s26, 16  ;;  %s569_s27 = scalar_lea.vmem %s464_s26, 32 }
  0x23   :  { %336 = vmatprep.subr.bf16.mxu1 %v541_v23  ;;  %v153_v60 = vrot.slane %v148_v59, %v39_v41  ;;  %v157_v61 = vrot.slane %v148_v59, %v43_v43  ;;  %v378_v6 = vrot.slane %v363_v56, %v39_v41  ;;  %p566_p0 = scmp.ne.s32.totalorder %s464_s26, %s565_s4  ;;  %p570_p1 = scmp.lt.s32.totalorder %s464_s26, %s464_s26 }
  0x24   :  { %449 = vmatprep.mubr.f32.mxu0 %v382_v57  ;;  %p571_p2 = scmp.lt.s32.totalorder %s569_s27, %s565_s4 }
  0x26   :  { %337 = vmatpush2.bf16.msra.mxu1 %v543_v24  ;;  %p572_p3 = por %p571_p2, %p570_p1 }
  0x27   :  { %338 = vmatprep.subr.bf16.mxu1 %v544_v25 }
  0x28   :  { %p573_p4 = pnand %p572_p3, %p566_p0 }
  0x2a   :  { %339 = vmatpush2.bf16.msra.mxu1 %v546_v26 }
  0x2b   :  { %340 = vmatprep.subr.bf16.mxu1 %v547_v27 }
  0x2e   :  { %341 = vmatpush2.bf16.msra.mxu1 %v549_v28 }
  0x2f   :  { %342 = vmatprep.subr.bf16.mxu1 %v550_v29 }
  0x32   :  { %343 = vmatpush2.bf16.msra.mxu1 %v552_v30 }
  0x33   :  { %344 = vmatprep.subr.bf16.mxu1 %v553_v31 }
  0x36   :  { %345 = vmatpush2.bf16.msra.mxu1 %v555_v32 }
  0x37   :  { %346 = vmatprep.subr.bf16.mxu1 %v556_v33 }
  0x3a   :  { %347 = vmatpush2.bf16.msra.mxu1 %v558_v34 }
  0x3b   :  { %348 = vmatprep.subr.bf16.mxu1 %v559_v35 }
  0x3e   :  { %349 = vmatpush2.bf16.msra.mxu1 %v561_v36 }
  0x3f   :  { %350 = vmatprep.subr.bf16.mxu1 %v562_v37 }
  0x42   :  { %351 = vmatpush2.bf16.msra.mxu1 %v564_v38 }
  0x9d   :  { %v368_v7 = vpop.permute.xlu0 %367 }
  0x9e   :  { %v373_v8 = vrot.slane %v368_v7, %v39_v41 }
  0xcd   :  { %v105_v46 = vpop.f32.mrf.mxu0 }
  0xce   :  { %v106_v47 = vadd.f32 %v105_v46, %v40_v44 }
  0xcf   :  { %v107_v48 = vpop.f32.mrf.mxu0 }
  0xd0   :  { %v108_v49 = vadd.f32 %v107_v48, %v44_v45  ;;  %v112_v50 = vmax.f32 %v106_v47, 0.0 }
  0xd1   :  { %v109_v51 = vpop.f32.mrf.mxu0 }
  0xd2   :  { %v113_v52 = vmax.f32 %v108_v49, 0.0  ;;  %v114_v55 = vpack.c.bf16 %v112_v50, %v112_v50 }
  0xd3   :  { %v110_v53 = vpop.f32.mrf.mxu0 }
  0xd4   :  { %v115_v54 = vpack.c.bf16 %v113_v52, %v113_v52 }
  0xd6   :  { %352 = vmatprep.mubr.bf16.mxu1 %v115_v54 }
  0xd7   :  { %353 = vmatmul.mubr.bf16.vlgmr.msra.gmra.mxu1 %v114_v55 }
 0x197   :  { %v354_v62 = vpop.f32.mrf.mxu1 }
 0x198   :  { %v355_v63 = vadd.f32 %v354_v62, %v153_v60 }
 0x199   :  { %v356_v0 = vpop.f32.mrf.mxu1 }
 0x19a   :  { %v357_v1 = vadd.f32 %v356_v0, %v157_v61  ;;  %v361_v4 = vmax.f32 %v355_v63, 0.0 }
 0x19b   :  { %v358_v2 = vpop.f32.mrf.mxu1 }
 0x19c   :  { %v362_v3 = vmax.f32 %v357_v1, 0.0 }
 0x19d   :  { %v359_v5 = vpop.f32.mrf.mxu1 }
 0x19e   :  { %415 = vmatprep.subr.mxu0 %v362_v3 }
 0x19f   :  { %416 = vmatpush1.xpose.msra.mxu0 %v361_v4 }
 0x1a2   :  { %450 = vmatmul.mubr.f32.vlgmr.msra.gmra.mxu0 %v378_v6 }
 0x262   :  { %v451_v9 = vpop.f32.mrf.mxu0 }
 0x263   :  { %v452_v10 = vadd.f32 %v451_v9, %v373_v8 }
 0x264   :  { %v453_v11 = vpop.f32.mrf.mxu0 }
 0x265   :  { %456 = vst.msk [vmem:[#allocation3] sm:$0x1] %vm455_vm1, %v452_v10 }
 0x266   :  { %576 = shalt.err (!%p573_p4)
}
 0x267   :  { %466 = dma.vmem_to_hbm [thread:$0]  %s464_s26, 16, %s762_s7, [#allocation4]  }
 0x268   :  { %585 = dma.done.wait [#allocation4], 16  }
 0x269   :  { %586 = vsyncadd [#allocation4], 4294967280 }
 0x26a   :  { %470 = vsyncpa [#allocation4], 1 }

</bundles_post_ra>
